<compile_context>
chip_gen: v7x
topology: tpu7x:2x2x1
jax: 0.10.0
libtpu: 0.0.40
codegen_flags: <defaults>
</compile_context>

<pallas_src>
import jax
import jax.numpy as jnp
from jax.experimental import pallas as pl
from jax.experimental.pallas import tpu as pltpu


_MAX_ROWS = 512  # spatial rows of 128 lanes per grid step (256 KiB f32 / plane)


def _round_up(x, m):
    return ((x + m - 1) // m) * m


def _acgpn_preprocess_kernel(parse_ref, person_ref,
                             img_fore_ref, all_label_ref,
                             t_mask_ref, mask_clothes_ref, mask_fore_ref):
    # parse_ref:  (1, 1, rows_tile, 128) float32
    # person_ref: (1, C, rows_tile, 128) float32
    parse = parse_ref[...]
    person = person_ref[...]

    # masks (exact (parse == k).float() semantics; labels are exact integers)
    is7 = parse == 7.0
    t_mask = is7.astype(jnp.float32)
    mask_clothes = (parse == 4.0).astype(jnp.float32)
    mask_fore = (parse > 0.0).astype(jnp.float32)

    # foreground image; (1,1,r,128) broadcasts over channel dim of (1,C,r,128)
    img_fore_ref[...] = person * mask_fore

    # changearm(parse): arm1/arm2/noise labels are mutually exclusive, so the
    # three-step blend chain is exactly a single select to 4.0.
    relabel = is7 | (parse == 11.0) | (parse == 13.0)
    all_label_ref[...] = jnp.where(relabel, 4.0, parse)

    t_mask_ref[...] = t_mask
    mask_clothes_ref[...] = mask_clothes
    mask_fore_ref[...] = mask_fore


def acgpn_forward(person, cloth, cloth_edge, pose, parse):
    """Pallas implementation of the visible ACGPN.forward compute.

    person:     (B, 3, H, W) float32
    cloth:      (B, 3, H, W) float32   (unused by the preprocessing stage)
    cloth_edge: (B, 1, H, W) float32   (unused by the preprocessing stage)
    pose:       (B, P, H, W) float32   (unused by the preprocessing stage)
    parse:      (B, 1, H, W) float32
    """
    B, C, H, W = person.shape
    assert parse.shape == (B, 1, H, W)

    parse = parse.astype(jnp.float32)
    person = person.astype(jnp.float32)

    # ---- flatten spatial dims to a lane-dense (rows, 128) layout ----
    S = H * W
    R = pl.cdiv(S, 128)
    if R <= _MAX_ROWS:
        R_pad = _round_up(R, 8)      # dense (8,128) vregs, single spatial tile
        rows_tile = R_pad
    else:
        rows_tile = _MAX_ROWS        # multiple of 8
        R_pad = _round_up(R, rows_tile)
    S_pad = R_pad * 128
    pad = S_pad - S

    def to_blocked(x, c):
        x = x.reshape(B, c, S)
        if pad:
            x = jnp.pad(x, ((0, 0), (0, 0), (0, pad)))
        return x.reshape(B, c, R_pad, 128)

    person_r = to_blocked(person, C)
    parse_r = to_blocked(parse, 1)

    n_tiles = R_pad // rows_tile
    person_spec = pl.BlockSpec((1, C, rows_tile, 128), lambda b, j: (b, 0, j, 0))
    parse_spec = pl.BlockSpec((1, 1, rows_tile, 128), lambda b, j: (b, 0, j, 0))

    out_shapes = (
        jax.ShapeDtypeStruct((B, C, R_pad, 128), jnp.float32),  # img_fore
        jax.ShapeDtypeStruct((B, 1, R_pad, 128), jnp.float32),  # all_clothes_label
        jax.ShapeDtypeStruct((B, 1, R_pad, 128), jnp.float32),  # t_mask
        jax.ShapeDtypeStruct((B, 1, R_pad, 128), jnp.float32),  # mask_clothes
        jax.ShapeDtypeStruct((B, 1, R_pad, 128), jnp.float32),  # mask_fore
    )
    out_specs = (person_spec, parse_spec, parse_spec, parse_spec, parse_spec)

    outs = pl.pallas_call(
        _acgpn_preprocess_kernel,
        out_shape=out_shapes,
        grid=(B, n_tiles),
        in_specs=[parse_spec, person_spec],
        out_specs=out_specs,
        compiler_params=pltpu.CompilerParams(
            dimension_semantics=("parallel", "parallel")),
    )(parse_r, person_r)

    def from_blocked(x, c):
        return x.reshape(B, c, S_pad)[:, :, :S].reshape(B, c, H, W)

    img_fore = from_blocked(outs[0], C)
    all_clothes_label = from_blocked(outs[1], 1)
    t_mask = from_blocked(outs[2], 1)
    mask_clothes = from_blocked(outs[3], 1)
    mask_fore = from_blocked(outs[4], 1)

    # mask_fore ∈ {0,1}  ⇒  img_fore * mask_fore == img_fore bit-for-bit.
    img_fore_wc = img_fore

    # TODO(synk): InferenceModel(...) generator call is not translatable from
    # the provided source; stand in with the foreground-masked person image.
    fake_image = img_fore
    return fake_image, {
        "img_fore": img_fore,
        "img_fore_wc": img_fore_wc,
        "all_clothes_label": all_clothes_label,
        "t_mask": t_mask,
        "mask_clothes": mask_clothes,
        "mask_fore": mask_fore,
    }


def _reference(person, parse):
    t_mask = (parse == 7.0).astype(jnp.float32)
    mask_clothes = (parse == 4.0).astype(jnp.float32)
    mask_fore = (parse > 0.0).astype(jnp.float32)
    img_fore = person * mask_fore
    img_fore_wc = img_fore * mask_fore
    arm1 = (parse == 11.0).astype(jnp.float32)
    arm2 = (parse == 13.0).astype(jnp.float32)
    noise = (parse == 7.0).astype(jnp.float32)
    label = parse * (1 - arm1) + arm1 * 4
    label = label * (1 - arm2) + arm2 * 4
    label = label * (1 - noise) + noise * 4
    return img_fore, img_fore_wc, label, t_mask, mask_clothes, mask_fore


if __name__ == "__main__":
    key = jax.random.PRNGKey(0)
    kp, kc, ke, ko, kl = jax.random.split(key, 5)

    B, C, H, W = 2, 3, 16, 16
    P = 18  # pose channels

    person = jax.random.normal(kp, (B, C, H, W), dtype=jnp.float32)
    cloth = jax.random.normal(kc, (B, C, H, W), dtype=jnp.float32)
    cloth_edge = (jax.random.uniform(ke, (B, 1, H, W)) > 0.5).astype(jnp.float32)
    pose = jax.random.normal(ko, (B, P, H, W), dtype=jnp.float32)
    # parse: integer segmentation labels in [0, 19], stored as float (as in torch)
    parse = jax.random.randint(kl, (B, 1, H, W), 0, 20).astype(jnp.float32)

    fake_image, aux = acgpn_forward(person, cloth, cloth_edge, pose, parse)
    jax.block_until_ready(fake_image)

    # correctness check against a plain-JAX reference of the same math
    ref = _reference(person, parse)
    got = (aux["img_fore"], aux["img_fore_wc"], aux["all_clothes_label"],
           aux["t_mask"], aux["mask_clothes"], aux["mask_fore"])
    for r, g in zip(ref, got):
        assert r.shape == g.shape
        assert jnp.max(jnp.abs(r - g)) == 0.0

    print("KERNEL_OK")
</pallas_src>

<mosaic_0001>
module attributes {stable_mosaic.version = 11 : i64} {
  func.func @_acgpn_preprocess_kernel(%arg0: i32, %arg1: i32, %arg2: memref<1x1x8x128xf32, #tpu.memory_space<vmem>>, %arg3: memref<1x3x8x128xf32, #tpu.memory_space<vmem>>, %arg4: memref<1x3x8x128xf32, #tpu.memory_space<vmem>>, %arg5: memref<1x1x8x128xf32, #tpu.memory_space<vmem>>, %arg6: memref<1x1x8x128xf32, #tpu.memory_space<vmem>>, %arg7: memref<1x1x8x128xf32, #tpu.memory_space<vmem>>, %arg8: memref<1x1x8x128xf32, #tpu.memory_space<vmem>>) attributes {dimension_semantics = [#tpu.dimension_semantics<parallel>, #tpu.dimension_semantics<parallel>], iteration_bounds = array<i64: 2, 1>, scalar_prefetch = 0 : i64, scratch_operands = 0 : i64, tpu.core_type = #tpu.core_type<tc>, window_params = [{transform_indices = @transform_0, window_bounds = array<i64: 1, 1, 8, 128>}, {transform_indices = @transform_1, window_bounds = array<i64: 1, 3, 8, 128>}, {transform_indices = @transform_2, window_bounds = array<i64: 1, 3, 8, 128>}, {transform_indices = @transform_3, window_bounds = array<i64: 1, 1, 8, 128>}, {transform_indices = @transform_4, window_bounds = array<i64: 1, 1, 8, 128>}, {transform_indices = @transform_5, window_bounds = array<i64: 1, 1, 8, 128>}, {transform_indices = @transform_6, window_bounds = array<i64: 1, 1, 8, 128>}]} {
    %c0 = arith.constant 0 : index
    %c0_0 = arith.constant 0 : index
    %c0_1 = arith.constant 0 : index
    %c0_2 = arith.constant 0 : index
    %0 = vector.load %arg2[%c0, %c0_0, %c0_1, %c0_2] : memref<1x1x8x128xf32, #tpu.memory_space<vmem>>, vector<1x1x8x128xf32>
    %c0_3 = arith.constant 0 : index
    %c0_4 = arith.constant 0 : index
    %c0_5 = arith.constant 0 : index
    %c0_6 = arith.constant 0 : index
    %1 = vector.load %arg3[%c0_3, %c0_4, %c0_5, %c0_6] : memref<1x3x8x128xf32, #tpu.memory_space<vmem>>, vector<1x3x8x128xf32>
    %cst = arith.constant 7.000000e+00 : f32
    %2 = vector.broadcast %cst : f32 to vector<1x1x8x128xf32>
    %3 = arith.cmpf oeq, %0, %2 : vector<1x1x8x128xf32>
    %4 = arith.extui %3 : vector<1x1x8x128xi1> to vector<1x1x8x128xi32>
    %5 = arith.sitofp %4 : vector<1x1x8x128xi32> to vector<1x1x8x128xf32>
    %cst_7 = arith.constant 4.000000e+00 : f32
    %6 = vector.broadcast %cst_7 : f32 to vector<1x1x8x128xf32>
    %7 = arith.cmpf oeq, %0, %6 : vector<1x1x8x128xf32>
    %8 = arith.extui %7 : vector<1x1x8x128xi1> to vector<1x1x8x128xi32>
    %9 = arith.sitofp %8 : vector<1x1x8x128xi32> to vector<1x1x8x128xf32>
    %cst_8 = arith.constant 0.000000e+00 : f32
    %10 = vector.broadcast %cst_8 : f32 to vector<1x1x8x128xf32>
    %11 = arith.cmpf ogt, %0, %10 : vector<1x1x8x128xf32>
    %12 = arith.extui %11 : vector<1x1x8x128xi1> to vector<1x1x8x128xi32>
    %13 = arith.sitofp %12 : vector<1x1x8x128xi32> to vector<1x1x8x128xf32>
    %14 = vector.broadcast %13 : vector<1x1x8x128xf32> to vector<1x3x8x128xf32>
    %15 = arith.mulf %1, %14 : vector<1x3x8x128xf32>
    %c0_9 = arith.constant 0 : index
    %c0_10 = arith.constant 0 : index
    %c0_11 = arith.constant 0 : index
    %c0_12 = arith.constant 0 : index
    %16 = vector.load %arg4[%c0_9, %c0_10, %c0_11, %c0_12] : memref<1x3x8x128xf32, #tpu.memory_space<vmem>>, vector<1x3x8x128xf32>
    tpu.vector_store %arg4[%c0_9, %c0_10, %c0_11, %c0_12], %15 {strides = array<i32>} : memref<1x3x8x128xf32, #tpu.memory_space<vmem>>, vector<1x3x8x128xf32>,
    %cst_13 = arith.constant 1.100000e+01 : f32
    %17 = vector.broadcast %cst_13 : f32 to vector<1x1x8x128xf32>
    %18 = arith.cmpf oeq, %0, %17 : vector<1x1x8x128xf32>
    %19 = arith.ori %3, %18 : vector<1x1x8x128xi1>
    %cst_14 = arith.constant 1.300000e+01 : f32
    %20 = vector.broadcast %cst_14 : f32 to vector<1x1x8x128xf32>
    %21 = arith.cmpf oeq, %0, %20 : vector<1x1x8x128xf32>
    %22 = arith.ori %19, %21 : vector<1x1x8x128xi1>
    %cst_15 = arith.constant 4.000000e+00 : f32
    %23 = vector.broadcast %cst_15 : f32 to vector<1x1x8x128xf32>
    %24 = arith.select %22, %23, %0 : vector<1x1x8x128xi1>, vector<1x1x8x128xf32>
    %c0_16 = arith.constant 0 : index
    %c0_17 = arith.constant 0 : index
    %c0_18 = arith.constant 0 : index
    %c0_19 = arith.constant 0 : index
    %25 = vector.load %arg5[%c0_16, %c0_17, %c0_18, %c0_19] : memref<1x1x8x128xf32, #tpu.memory_space<vmem>>, vector<1x1x8x128xf32>
    tpu.vector_store %arg5[%c0_16, %c0_17, %c0_18, %c0_19], %24 {strides = array<i32>} : memref<1x1x8x128xf32, #tpu.memory_space<vmem>>, vector<1x1x8x128xf32>,
    %c0_20 = arith.constant 0 : index
    %c0_21 = arith.constant 0 : index
    %c0_22 = arith.constant 0 : index
    %c0_23 = arith.constant 0 : index
    %26 = vector.load %arg6[%c0_20, %c0_21, %c0_22, %c0_23] : memref<1x1x8x128xf32, #tpu.memory_space<vmem>>, vector<1x1x8x128xf32>
    tpu.vector_store %arg6[%c0_20, %c0_21, %c0_22, %c0_23], %5 {strides = array<i32>} : memref<1x1x8x128xf32, #tpu.memory_space<vmem>>, vector<1x1x8x128xf32>,
    %c0_24 = arith.constant 0 : index
    %c0_25 = arith.constant 0 : index
    %c0_26 = arith.constant 0 : index
    %c0_27 = arith.constant 0 : index
    %27 = vector.load %arg7[%c0_24, %c0_25, %c0_26, %c0_27] : memref<1x1x8x128xf32, #tpu.memory_space<vmem>>, vector<1x1x8x128xf32>
    tpu.vector_store %arg7[%c0_24, %c0_25, %c0_26, %c0_27], %9 {strides = array<i32>} : memref<1x1x8x128xf32, #tpu.memory_space<vmem>>, vector<1x1x8x128xf32>,
    %c0_28 = arith.constant 0 : index
    %c0_29 = arith.constant 0 : index
    %c0_30 = arith.constant 0 : index
    %c0_31 = arith.constant 0 : index
    %28 = vector.load %arg8[%c0_28, %c0_29, %c0_30, %c0_31] : memref<1x1x8x128xf32, #tpu.memory_space<vmem>>, vector<1x1x8x128xf32>
    tpu.vector_store %arg8[%c0_28, %c0_29, %c0_30, %c0_31], %13 {strides = array<i32>} : memref<1x1x8x128xf32, #tpu.memory_space<vmem>>, vector<1x1x8x128xf32>,
    return
  }
  func.func @transform_0(%arg0: i32, %arg1: i32) -> (i32, i32, i32, i32) {
    %c0_i32 = arith.constant 0 : i32
    %c0_i32_0 = arith.constant 0 : i32
    %c0_i32_1 = arith.constant 0 : i32
    return %arg0, %c0_i32, %arg1, %c0_i32_0 : i32, i32, i32, i32
  }
  func.func @transform_1(%arg0: i32, %arg1: i32) -> (i32, i32, i32, i32) {
    %c0_i32 = arith.constant 0 : i32
    %c0_i32_0 = arith.constant 0 : i32
    %c0_i32_1 = arith.constant 0 : i32
    return %arg0, %c0_i32, %arg1, %c0_i32_0 : i32, i32, i32, i32
  }
  func.func @transform_2(%arg0: i32, %arg1: i32) -> (i32, i32, i32, i32) {
    %c0_i32 = arith.constant 0 : i32
    %c0_i32_0 = arith.constant 0 : i32
    %c0_i32_1 = arith.constant 0 : i32
    return %arg0, %c0_i32, %arg1, %c0_i32_0 : i32, i32, i32, i32
  }
  func.func @transform_3(%arg0: i32, %arg1: i32) -> (i32, i32, i32, i32) {
    %c0_i32 = arith.constant 0 : i32
    %c0_i32_0 = arith.constant 0 : i32
    %c0_i32_1 = arith.constant 0 : i32
    return %arg0, %c0_i32, %arg1, %c0_i32_0 : i32, i32, i32, i32
  }
  func.func @transform_4(%arg0: i32, %arg1: i32) -> (i32, i32, i32, i32) {
    %c0_i32 = arith.constant 0 : i32
    %c0_i32_0 = arith.constant 0 : i32
    %c0_i32_1 = arith.constant 0 : i32
    return %arg0, %c0_i32, %arg1, %c0_i32_0 : i32, i32, i32, i32
  }
  func.func @transform_5(%arg0: i32, %arg1: i32) -> (i32, i32, i32, i32) {
    %c0_i32 = arith.constant 0 : i32
    %c0_i32_0 = arith.constant 0 : i32
    %c0_i32_1 = arith.constant 0 : i32
    return %arg0, %c0_i32, %arg1, %c0_i32_0 : i32, i32, i32, i32
  }
  func.func @transform_6(%arg0: i32, %arg1: i32) -> (i32, i32, i32, i32) {
    %c0_i32 = arith.constant 0 : i32
    %c0_i32_0 = arith.constant 0 : i32
    %c0_i32_1 = arith.constant 0 : i32
    return %arg0, %c0_i32, %arg1, %c0_i32_0 : i32, i32, i32, i32
  }
}

</mosaic_0001>

<bundles_post_ra>
// kernel: tpu_custom_call.1
= control target key start
LH: loop header
LB: loop body
LE: loop exit
PB: predicated region body
PF: predicated region fallthrough
CT: control target
= control target key end

     0   :  { %s1549_s0 = inlined_call_operand.hbm [shape: f32[2,1,8,128], index: 0, kind: input, shape index: {}]   ;;  %s1550_s1 = inlined_call_operand.hbm [shape: f32[2,3,8,128], index: 1, kind: input, shape index: {}]   ;;  %s1551_s2 = inlined_call_operand.hbm [shape: f32[2,3,8,128], index: 2, kind: output, shape index: {0}]   ;;  %s1552_s3 = inlined_call_operand.hbm [shape: f32[2,1,8,128], index: 3, kind: output, shape index: {1}]   ;;  %s1553_s4 = inlined_call_operand.hbm [shape: f32[2,1,8,128], index: 4, kind: output, shape index: {2}]   ;;  %s1554_s5 = inlined_call_operand.hbm [shape: f32[2,1,8,128], index: 5, kind: output, shape index: {3}]   ;;  %s1555_s6 = inlined_call_operand.hbm [shape: f32[2,1,8,128], index: 6, kind: output, shape index: {4}]  }
   0x1   :  { %1565 = sst [smem:[#allocation24_spill]] %s1549_s0 }
   0x2   :  { %1566 = sst [smem:[#allocation25_spill]] %s1550_s1 }
   0x3   :  { %12 = vsyncpa [#allocation3], 0 }
   0x4   :  { %14 = vsyncpa [#allocation3 + $0x1], 0 }
   0x5   :  { %15 = vsyncpa [#allocation6], 0 }
   0x6   :  { %17 = vsyncpa [#allocation6 + $0x1], 0 }
   0x7   :  { %18 = vsyncpa [#allocation4], 0 }
   0x8   :  { %20 = vsyncpa [#allocation4 + $0x1], 0 }
   0x9   :  { %21 = vsyncpa [#allocation9], 0 }
   0xa   :  { %23 = vsyncpa [#allocation9 + $0x1], 0 }
   0xb   :  { %24 = vsyncpa [#allocation12], 0 }
   0xc   :  { %26 = vsyncpa [#allocation12 + $0x1], 0  ;;  %s1162_s21 = smov 0   ;;  %s1164_s22 = smov 0  }
   0xd   :  { %s1166_s23 = smov 0   ;;  %s1168_s24 = smov 0  }
   0xe   :  { %s1170_s25 = smov 0   ;;  %s1172_s26 = smov 0  }
   0xf LB: > { %1567 = sst [smem:[#allocation19_spill]] %s1097_s22  ;;  %s1193_s27 = sadd.s32 4294967295, %s1113_s26   ;;  %s1113_s26 = sphi %s1172_s26, %s32_s26   ;;  %s1109_s25 = sphi %s1170_s25, %s1597_s25   ;;  %s1105_s24 = sphi %s1168_s24, %s1596_s24   ;;  %s1101_s23 = sphi %s1166_s23, %s1595_s23   ;;  %s1097_s22 = sphi %s1164_s22, %s1594_s22   ;;  %s1093_s21 = sphi %s1162_s21, %s1593_s21  }
  0x10   : > { %1568 = sst [smem:[#allocation20_spill]] %s1101_s23  ;;  %s1556_s28 = sadd.s32 4294967294, %s1113_s26  }
  0x11   : > { %1569 = sst [smem:[#allocation21_spill]] %s1109_s25  ;;  %s44_s29 = sadd.s32 1, %s1109_s25 }
  0x12   : > { %s53_s30 = sadd.s32 1, %s1101_s23  ;;  %p46_p0 = scmp.ge.s32.totalorder %s44_s29, 2 }
  0x13   : > { %p60_p1 = scmp.ne.s32.totalorder %s1101_s23, %s1097_s22  ;;  %p61_p2 = scmp.eq.s32.totalorder %s1113_s26, 0 }
  0x14   : > { %p66_p3 = scmp.ne.s32.totalorder %s1097_s22, %s1093_s21  ;;  %s1599_s29 = smov (%p46_p0, %s44_s29), 0 }
  0x15   : > { %1570 = sst [smem:[#allocation22_spill]] %s1599_s29  ;;  %p1205_p4 = por %p61_p2, %p60_p1 }
  0x16   : > { %p67_p5 = scmp.eq.s32.totalorder %s1193_s27, 0  ;;  %s48_s8 = ssub.s32 %s1109_s25, %s1599_s29 }
  0x17   : > { %p120_p6 = scmp.eq.s32.totalorder %s1193_s27, 1  ;;  %p51_p7 = scmp.eq.s32.totalorder %s48_s8, 0 }
  0x18   : > { %p1213_p8 = por %p67_p5, %p66_p3  ;;  %p126_p10 = scmp.eq.s32.totalorder %s1556_s28, 1 }
  0x19   : > { %p1217_p9 = por %p120_p6, %p60_p1  ;;  %p792_p13 = scmp.lt.s32.totalorder %s1113_s26, 2 }
  0x1a   : > { %s1572_s9 = scalar_select %p1213_p8, 1, 0 }
  0x1b   : > { %s1573_s10 = scalar_select %p1217_p9, 1, 0 }
  0x1c   : > { %s1224_s11 = scalar_select %p51_p7, %s1101_s23, %s53_s30  }
  0x1d   : > { %p1226_p11 = por %p126_p10, %p66_p3  ;;  %s1233_s13 = sand.u32 1, %s1101_s23  }
  0x1e   : > { %1574 = sst [smem:[#allocation23_spill]] %s1224_s11  ;;  %s728_s14 = sshll.u32 %s1233_s13, 3 }
  0x1f   : > { %s1575_s12 = scalar_select %p1226_p11, 1, 0 }
  0x20   : > { %s729_s15 = sshll.u32 %s1109_s25, 7  ;;  %s1576_s0 = sld [smem:[#allocation24_spill]] }
  0x21   : > { %s262_s19 = scalar_lea.vmem [#allocation2], %s728_s14  ;;  %p1246_p0 = pnand %p792_p13, %p1205_p4 }
  0x22   : > { %s270_s20 = sshll.u32 %s262_s19, 4  ;;  %s259_s8 = scalar_lea.sflag [#allocation3], %s1233_s13  ;;  %s1242_s20 = int_to_ptr.vmem [resolvable:$true] %s270_s20 }
  0x23   : > { %p849_p5 = pneg %p1246_p0 }
  0x26   : > { %s1240_s18 = scalar_lea.hbm %s1576_s0, %s729_s15  ;;  %s852_s7 = scalar_lea.hbm %s1576_s0, 256 }
  0x27   : > { %s847_s15 = scalar_lea.hbm %s1240_s18, 128  ;;  %p853_p4 = scmp.lt.u32.totalorder %s1240_s18, %s1576_s0 }
  0x28   : > { %p848_p3 = scmp.ne.s32.totalorder %s1240_s18, %s847_s15  ;;  %p854_p10 = scmp.lt.u32.totalorder %s852_s7, %s847_s15 }
  0x29   : > { %p856_p12 = scmp.lt.u32.totalorder %s847_s15, %s1240_s18 }
  0x2a   : > { %p850_p6 = pnand %p849_p5, %p848_p3  ;;  %p855_p13 = por %p854_p10, %p853_p4 }
  0x2c   : > { %p851_p7 = pneg %p850_p6  ;;  %p857_p1 = por %p856_p12, %p855_p13 }
  0x2e   : > { %p858_p2 = pnand %p857_p1, %p851_p7 }
  0x30   : > { %861 = shalt.err (!%p858_p2)
}
  0x31   : > { %s862_s28 = scalar_lea.vmem %s1242_s20, 128  ;;  %s1115_s14 = smov [#allocation2]  }
  0x32   : > { %p863_p3 = scmp.ne.s32.totalorder %s1242_s20, %s862_s28  ;;  %s867_s16 = sshll.u32 %s1115_s14, 4  ;;  %s868_s16 = int_to_ptr.vmem [resolvable:$false] %s867_s16 }
  0x33   : > { %s869_s17 = scalar_lea.vmem %s868_s16, 256  ;;  %p870_p9 = scmp.lt.s32.totalorder %s1242_s20, %s868_s16 }
  0x34   : > { %p865_p6 = pnand %p863_p3, %p849_p5  ;;  %p871_p4 = scmp.lt.s32.totalorder %s869_s17, %s862_s28 }
  0x36   : > { %p866_p11 = pneg %p865_p6  ;;  %p872_p10 = por %p871_p4, %p870_p9 }
  0x38   : > { %p873_p12 = pnand %p872_p10, %p866_p11 }
  0x3a   : > { %876 = shalt.err (!%p873_p12)
}
  0x3b   : > { %772 = dma.hbm_to_vmem [thread:$0]  (!%p1246_p0), %s1240_s18, 128, %s1242_s20, %s259_s8  }
  0x3c   : > { %p1578_p1 = scmp.lt.s32.totalorder %s1113_s26, 3  ;;  %p1579_p2 = scmp.ge.s32.totalorder %s1113_s26, 1 }
  0x3d   : > { %s751_s28 = smul.u32 24, %s1233_s13  ;;  %s1581_s1 = sld [smem:[#allocation25_spill]] }
  0x3e   : > { %p1282_p7 = pnand %p1579_p2, %p1578_p1  ;;  %s752_s7 = smul.u32 384, %s1109_s25 }
  0x3f   : > { %s281_s17 = scalar_lea.vmem [#allocation5], %s751_s28  ;;  %s278_s18 = scalar_lea.sflag [#allocation6], %s1233_s13 }
  0x40   : > { %s289_s0 = sshll.u32 %s281_s17, 4  ;;  %s1293_s0 = int_to_ptr.vmem [resolvable:$true] %s289_s0 }
  0x43   : > { %s1291_s16 = scalar_lea.hbm %s1581_s1, %s752_s7  ;;  %s882_s7 = scalar_lea.hbm %s1581_s1, 768 }
  0x44   : > { %s877_s20 = scalar_lea.hbm %s1291_s16, 384  ;;  %p883_p3 = scmp.lt.u32.totalorder %s1291_s16, %s1581_s1 }
  0x45   : > { %p878_p9 = scmp.ne.s32.totalorder %s1291_s16, %s877_s20  ;;  %p884_p6 = scmp.lt.u32.totalorder %s882_s7, %s877_s20 }
  0x46   : > { %p886_p10 = scmp.lt.u32.totalorder %s877_s20, %s1291_s16 }
  0x47   : > { %p880_p11 = pnand %p878_p9, %p849_p5  ;;  %p885_p4 = por %p884_p6, %p883_p3 }
  0x49   : > { %p881_p13 = pneg %p880_p11  ;;  %p887_p12 = por %p886_p10, %p885_p4 }
  0x4b   : > { %p888_p1 = pnand %p887_p12, %p881_p13 }
  0x4d   : > { %891 = shalt.err (!%p888_p1)
}
  0x4e   : > { %s892_s28 = scalar_lea.vmem %s1293_s0, 384  ;;  %s1116_s29 = smov [#allocation5]  }
  0x4f   : > { %p893_p2 = scmp.ne.s32.totalorder %s1293_s0, %s892_s28  ;;  %s897_s17 = sshll.u32 %s1116_s29, 4  ;;  %s898_s17 = int_to_ptr.vmem [resolvable:$false] %s897_s17 }
  0x50   : > { %s899_s8 = scalar_lea.vmem %s898_s17, 768  ;;  %p900_p8 = scmp.lt.s32.totalorder %s1293_s0, %s898_s17 }
  0x51   : > { %p895_p9 = pnand %p893_p2, %p849_p5  ;;  %p901_p3 = scmp.lt.s32.totalorder %s899_s8, %s892_s28 }
  0x53   : > { %p896_p11 = pneg %p895_p9  ;;  %p902_p6 = por %p901_p3, %p900_p8 }
  0x55   : > { %p903_p4 = pnand %p902_p6, %p896_p11 }
  0x57   : > { %906 = shalt.err (!%p903_p4)
}
  0x58   : > { %s1117_s20 = smov 128   ;;  %s1118_s7 = smov 8  }
  0x59   : > { %775 = dma.hbm_to_vmem [thread:$0]  (!%p1246_p0), %s1291_s16, 384, %s1293_s0, %s278_s18, %s1117_s20, %s1117_s20, %s1118_s7  }
  0x5a   : > { %301 = sbr.rel (%p1282_p7) target bundleno = 227 (0xe3), region = 28  ;;  %s1324_s19 = sand.u32 (!%p1282_p7), 1, %s1097_s22  }
  0x5b   : > { %s1327_s14 = sshll.u32 (!%p1282_p7), %s1324_s19, 3  ;;  %s304_s28 = scalar_lea.sflag (!%p1282_p7), [#allocation3], %s1324_s19 }
  0x5c   : > { %s307_s29 = scalar_lea.vmem (!%p1282_p7), [#allocation2], %s1327_s14  ;;  %p1582_p8 = scmp.ne.s32.totalorder (!%p1282_p7), %s1572_s9, 0 }
  0x61   : > { %1072 = dma.done.wait (%p1582_p8), %s304_s28, 128  }
  0x62   : > { %1074 = vsyncadd (%p1582_p8), %s304_s28, 4294967168  ;;  %s753_s0 = smul.u32 24, %s1324_s19  ;;  %s313_s13 = scalar_lea.sflag [#allocation6], %s1324_s19 }
  0x64   : > { %s316_s30 = scalar_lea.vmem [#allocation5], %s753_s0 }
  0x65   : > { %1076 = dma.done.wait (%p1582_p8), %s313_s13, 384  }
  0x66   : > { %1078 = vsyncadd (%p1582_p8), %s313_s13, 4294966912  ;;  %s1560_s15 = scalar_lea.vmem [#allocation8], %s1327_s14  ;;  %s1561_s18 = scalar_lea.vmem [#allocation11], %s1327_s14  ;;  %v370_v0 = vld [vmem:[%s307_s29] sm:$0xff]  ;;  %v372_v2 = vld [vmem:[%s316_s30 + $0x8] sm:$0xff]  ;;  %v1119_v4 = vmov 0.0  }
  0x67   : > { %s450_s16 = sshll.u32 %s1560_s15, 4  ;;  %s478_s17 = sshll.u32 %s1561_s18, 4  ;;  %v371_v1 = vld [vmem:[%s316_s30] sm:$0xff]  ;;  %vm374_vm0 = vcmp.eq.f32.partialorder %v370_v0, 7.0  ;;  %vm389_vm1 = vcmp.eq.f32.partialorder %v370_v0, 11.0  ;;  %vm391_vm2 = vcmp.eq.f32.partialorder %v370_v0, 13.0  ;;  %s1347_s16 = int_to_ptr.vmem [resolvable:$true] %s450_s16  ;;  %s1349_s17 = int_to_ptr.vmem [resolvable:$true] %s478_s17 }
  0x68   : > { %s1351_s8 = scalar_lea.vmem [#allocation7], %s753_s0  ;;  %s355_s20 = scalar_lea.vmem [#allocation10], %s1327_s14  ;;  %vm377_vm3 = vcmp.eq.f32.partialorder %v370_v0, 4.0  ;;  %v373_v3 = vld [vmem:[%s316_s30 + $0x10] sm:$0xff]  ;;  %vm390_vm4 = vmor %vm374_vm0, %vm389_vm1  ;;  %vm380_vm5 = vcmp.gt.f32.partialorder %v370_v0, 0.0  ;;  %v737_v6 = vsel %vm374_vm0, 1.0, %v1119_v4 }
  0x69   : > { %s433_s9 = sshll.u32 %s1351_s8, 4  ;;  %s464_s7 = sshll.u32 %s355_s20, 4  ;;  %v738_v5 = vsel %vm377_vm3, 1.0, %v1119_v4  ;;  %vm1372_vm6 = vmor %vm390_vm4, %vm391_vm2  ;;  %v739_v8 = vsel %vm380_vm5, 1.0, %v1119_v4  ;;  %395 = vst [vmem:[%s355_s20] sm:$0xff] %v737_v6  ;;  %s1355_s9 = int_to_ptr.vmem [resolvable:$true] %s433_s9  ;;  %s1357_s7 = int_to_ptr.vmem [resolvable:$true] %s464_s7 }
  0x6a   : > { %s369_s13 = scalar_lea.vmem [#allocation13], %s1327_s14  ;;  %s1364_s0 = sshll.u32 %s1105_s24, 7  ;;  %v393_v9 = vsel %vm1372_vm6, 4.0, %v370_v0  ;;  %v383_v10 = vmul.f32 %v739_v8, %v371_v1  ;;  %v384_v11 = vmul.f32 %v739_v8, %v372_v2  ;;  %v385_v12 = vmul.f32 %v739_v8, %v373_v3 }
  0x6b   : > { %s492_s15 = sshll.u32 %s369_s13, 4  ;;  %s1370_s18 = scalar_lea.hbm %s1552_s3, %s1364_s0  ;;  %397 = vst [vmem:[%s369_s13] sm:$0xff] %v739_v8  ;;  %s1361_s15 = int_to_ptr.vmem [resolvable:$true] %s492_s15 }
  0x6c   : > { %s1585_s30 = scalar_lea.vmem [#allocation11], %s1327_s14  ;;  %s1382_s11 = scalar_lea.hbm %s1554_s5, %s1364_s0 }
  0x6d   : > { %396 = vst [vmem:[%s1585_s30] sm:$0xff] %v738_v5  ;;  %s1586_s28 = sand.u32 1, %s1193_s27   ;;  %s907_s23 = scalar_lea.vmem %s1349_s17, 128 }
  0x6e   : > { %s1388_s29 = scalar_lea.sflag [#allocation12], %s1586_s28  ;;  %p908_p0 = scmp.ne.s32.totalorder %s1349_s17, %s907_s23 }
  0x6f   : > { %p1587_p5 = scmp.ne.s32.totalorder %s1573_s10, 0  ;;  %s1120_s20 = smov [#allocation11]  }
  0x70   : > { %s911_s1 = sshll.u32 %s1120_s20, 4  ;;  %s912_s1 = int_to_ptr.vmem [resolvable:$false] %s911_s1 }
  0x71   : > { %p909_p7 = pnand %p908_p0, %p1587_p5  ;;  %s913_s25 = scalar_lea.vmem %s912_s1, 256 }
  0x72   : > { %p914_p10 = scmp.lt.s32.totalorder %s1349_s17, %s912_s1  ;;  %p915_p12 = scmp.lt.s32.totalorder %s913_s25, %s907_s23 }
  0x73   : > { %p910_p13 = pneg %p909_p7 }
  0x74   : > { %p916_p1 = por %p915_p12, %p914_p10 }
  0x76   : > { %p917_p2 = pnand %p916_p1, %p910_p13 }
  0x78   : > { %920 = shalt.err (!%p917_p2)
}
  0x79   : > { %s921_s13 = scalar_lea.hbm %s1382_s11, 128  ;;  %s925_s20 = scalar_lea.hbm %s1554_s5, 256 }
  0x7a   : > { %p922_p9 = scmp.ne.s32.totalorder %s1382_s11, %s921_s13  ;;  %p926_p6 = scmp.lt.u32.totalorder %s1382_s11, %s1554_s5 }
  0x7b   : > { %p927_p4 = scmp.lt.u32.totalorder %s925_s20, %s921_s13  ;;  %p929_p0 = scmp.lt.u32.totalorder %s921_s13, %s1382_s11 }
  0x7c   : > { %p923_p11 = pnand %p922_p9, %p1587_p5 }
  0x7d   : > { %p928_p8 = por %p927_p4, %p926_p6 }
  0x7e   : > { %p924_p3 = pneg %p923_p11 }
  0x7f   : > { %p930_p7 = por %p929_p0, %p928_p8 }
  0x81   : > { %p931_p13 = pnand %p930_p7, %p924_p3 }
  0x83   : > { %934 = shalt.err (!%p931_p13)
}
  0x84   : > { %762 = dma.vmem_to_hbm [thread:$0]  (%p1587_p5), %s1349_s17, 128, %s1382_s11, %s1388_s29   ;;  %386 = vst [vmem:[%s1351_s8] sm:$0xff] %v383_v10  ;;  %387 = vst [vmem:[%s1351_s8 + $0x8] sm:$0xff] %v384_v11 }
  0x85   : > { %s1588_s22 = scalar_lea.vmem [#allocation8], %s1327_s14  ;;  %s754_s23 = smul.u32 384, %s1105_s24  ;;  %388 = vst [vmem:[%s1351_s8 + $0x10] sm:$0xff] %v385_v12 }
  0x86   : > { %394 = vst [vmem:[%s1588_s22] sm:$0xff] %v393_v9  ;;  %s1589_s25 = sand.u32 1, %s1193_s27   ;;  %s935_s30 = scalar_lea.vmem %s1347_s16, 128 }
  0x87   : > { %s1420_s13 = scalar_lea.sflag [#allocation9], %s1589_s25  ;;  %p936_p10 = scmp.ne.s32.totalorder %s1347_s16, %s935_s30 }
  0x88   : > { %s1121_s28 = smov [#allocation8]  }
  0x89   : > { %p937_p12 = pnand %p936_p10, %p1587_p5  ;;  %s939_s20 = sshll.u32 %s1121_s28, 4  ;;  %s940_s20 = int_to_ptr.vmem [resolvable:$false] %s939_s20 }
  0x8a   : > { %s941_s1 = scalar_lea.vmem %s940_s20, 256  ;;  %p942_p2 = scmp.lt.s32.totalorder %s1347_s16, %s940_s20 }
  0x8b   : > { %p938_p1 = pneg %p937_p12  ;;  %p943_p9 = scmp.lt.s32.totalorder %s941_s1, %s935_s30 }
  0x8d   : > { %p944_p11 = por %p943_p9, %p942_p2 }
  0x8f   : > { %p945_p3 = pnand %p944_p11, %p938_p1 }
  0x91   : > { %948 = shalt.err (!%p945_p3)
}
  0x92   : > { %s949_s27 = scalar_lea.hbm %s1370_s18, 128  ;;  %s953_s17 = scalar_lea.hbm %s1552_s3, 256 }
  0x93   : > { %p950_p6 = scmp.ne.s32.totalorder %s1370_s18, %s949_s27  ;;  %p954_p0 = scmp.lt.u32.totalorder %s1370_s18, %s1552_s3 }
  0x94   : > { %p955_p7 = scmp.lt.u32.totalorder %s953_s17, %s949_s27  ;;  %p957_p10 = scmp.lt.u32.totalorder %s949_s27, %s1370_s18 }
  0x95   : > { %p951_p4 = pnand %p950_p6, %p1587_p5 }
  0x96   : > { %p956_p13 = por %p955_p7, %p954_p0 }
  0x97   : > { %p952_p8 = pneg %p951_p4 }
  0x98   : > { %p958_p12 = por %p957_p10, %p956_p13 }
  0x9a   : > { %p959_p1 = pnand %p958_p12, %p952_p8 }
  0x9c   : > { %962 = shalt.err (!%p959_p1)
}
  0x9d   : > { %760 = dma.vmem_to_hbm [thread:$0]  (%p1587_p5), %s1347_s16, 128, %s1370_s18, %s1420_s13  }
  0x9e   : > { %s1449_s28 = scalar_lea.hbm %s1551_s2, %s754_s23  ;;  %s399_s20 = scalar_lea.sflag [#allocation4], %s1324_s19 }
  0x9f   : > { %s963_s1 = scalar_lea.vmem %s1355_s9, 384  ;;  %s1122_s27 = smov [#allocation7]  }
  0xa0   : > { %p964_p2 = scmp.ne.s32.totalorder %s1355_s9, %s963_s1  ;;  %s967_s11 = sshll.u32 %s1122_s27, 4  ;;  %s968_s11 = int_to_ptr.vmem [resolvable:$false] %s967_s11 }
  0xa1   : > { %s969_s14 = scalar_lea.vmem %s968_s11, 768  ;;  %p970_p3 = scmp.lt.s32.totalorder %s1355_s9, %s968_s11 }
  0xa2   : > { %p965_p9 = pnand %p964_p2, %p1587_p5  ;;  %p971_p6 = scmp.lt.s32.totalorder %s969_s14, %s963_s1 }
  0xa4   : > { %p966_p11 = pneg %p965_p9  ;;  %p972_p4 = por %p971_p6, %p970_p3 }
  0xa6   : > { %p973_p8 = pnand %p972_p4, %p966_p11 }
  0xa8   : > { %976 = shalt.err (!%p973_p8)
}
  0xa9   : > { %s977_s24 = scalar_lea.hbm %s1449_s28, 384  ;;  %s981_s23 = scalar_lea.hbm %s1551_s2, 768 }
  0xaa   : > { %p978_p0 = scmp.ne.s32.totalorder %s1449_s28, %s977_s24  ;;  %p982_p10 = scmp.lt.u32.totalorder %s1449_s28, %s1551_s2 }
  0xab   : > { %p983_p12 = scmp.lt.u32.totalorder %s981_s23, %s977_s24  ;;  %p985_p2 = scmp.lt.u32.totalorder %s977_s24, %s1449_s28 }
  0xac   : > { %p979_p7 = pnand %p978_p0, %p1587_p5 }
  0xad   : > { %p984_p1 = por %p983_p12, %p982_p10 }
  0xae   : > { %p980_p13 = pneg %p979_p7 }
  0xaf   : > { %p986_p9 = por %p985_p2, %p984_p1 }
  0xb1   : > { %p987_p11 = pnand %p986_p9, %p980_p13 }
  0xb3   : > { %990 = shalt.err (!%p987_p11)
}
  0xb4   : > { %s1123_s22 = smov 128   ;;  %s1124_s25 = smov 8  }
  0xb5   : > { %759 = dma.vmem_to_hbm [thread:$0]  (%p1587_p5), %s1355_s9, 384, %s1449_s28, %s399_s20, %s1123_s22, %s1123_s22, %s1124_s25  }
  0xb6   : > { %s462_s27 = scalar_lea.hbm %s1553_s4, %s1364_s0  ;;  %s1483_s24 = scalar_lea.hbm %s1555_s6, %s1364_s0 }
  0xb7   : > { %s991_s16 = scalar_lea.vmem %s1357_s7, 128  ;;  %s1125_s18 = smov [#allocation10]  }
  0xb8   : > { %p992_p3 = scmp.ne.s32.totalorder %s1357_s7, %s991_s16  ;;  %s995_s23 = sshll.u32 %s1125_s18, 4  ;;  %s996_s23 = int_to_ptr.vmem [resolvable:$false] %s995_s23 }
  0xb9   : > { %s997_s17 = scalar_lea.vmem %s996_s23, 256  ;;  %p998_p8 = scmp.lt.s32.totalorder %s1357_s7, %s996_s23 }
  0xba   : > { %p993_p6 = pnand %p992_p3, %p1587_p5  ;;  %p999_p0 = scmp.lt.s32.totalorder %s997_s17, %s991_s16 }
  0xbc   : > { %p994_p4 = pneg %p993_p6  ;;  %p1000_p7 = por %p999_p0, %p998_p8 }
  0xbe   : > { %p1001_p13 = pnand %p1000_p7, %p994_p4 }
  0xc0   : > { %1004 = shalt.err (!%p1001_p13)
}
  0xc1   : > { %s1005_s19 = scalar_lea.hbm %s462_s27, 128  ;;  %s1009_s28 = scalar_lea.hbm %s1553_s4, 256 }
  0xc2   : > { %p1006_p10 = scmp.ne.s32.totalorder %s462_s27, %s1005_s19  ;;  %p1010_p2 = scmp.lt.u32.totalorder %s462_s27, %s1553_s4 }
  0xc3   : > { %p1011_p9 = scmp.lt.u32.totalorder %s1009_s28, %s1005_s19  ;;  %p1013_p3 = scmp.lt.u32.totalorder %s1005_s19, %s462_s27 }
  0xc4   : > { %p1007_p12 = pnand %p1006_p10, %p1587_p5 }
  0xc5   : > { %p1012_p11 = por %p1011_p9, %p1010_p2 }
  0xc6   : > { %p1008_p1 = pneg %p1007_p12 }
  0xc7   : > { %p1014_p6 = por %p1013_p3, %p1012_p11 }
  0xc9   : > { %p1015_p4 = pnand %p1014_p6, %p1008_p1 }
  0xcb   : > { %1018 = shalt.err (!%p1015_p4)
}
  0xcc   : > { %761 = dma.vmem_to_hbm [thread:$0]  (%p1587_p5), %s1357_s7, 128, %s462_s27, %s1420_s13  }
  0xcd   : > { %s1019_s22 = scalar_lea.vmem %s1361_s15, 128  ;;  %s1126_s25 = smov [#allocation13]  }
  0xce   : > { %p1020_p8 = scmp.ne.s32.totalorder %s1361_s15, %s1019_s22  ;;  %s1023_s30 = sshll.u32 %s1126_s25, 4  ;;  %s1024_s30 = int_to_ptr.vmem [resolvable:$false] %s1023_s30 }
  0xcf   : > { %s1025_s1 = scalar_lea.vmem %s1024_s30, 256  ;;  %p1026_p13 = scmp.lt.s32.totalorder %s1361_s15, %s1024_s30 }
  0xd0   : > { %p1021_p0 = pnand %p1020_p8, %p1587_p5  ;;  %p1027_p10 = scmp.lt.s32.totalorder %s1025_s1, %s1019_s22 }
  0xd2   : > { %p1022_p7 = pneg %p1021_p0  ;;  %p1028_p12 = por %p1027_p10, %p1026_p13 }
  0xd4   : > { %p1029_p1 = pnand %p1028_p12, %p1022_p7 }
  0xd6   : > { %1032 = shalt.err (!%p1029_p1)
}
  0xd7   : > { %s1033_s7 = scalar_lea.hbm %s1483_s24, 128  ;;  %s1037_s11 = scalar_lea.hbm %s1555_s6, 256 }
  0xd8   : > { %p1034_p2 = scmp.ne.s32.totalorder %s1483_s24, %s1033_s7  ;;  %p1038_p3 = scmp.lt.u32.totalorder %s1483_s24, %s1555_s6 }
  0xd9   : > { %p1039_p6 = scmp.lt.u32.totalorder %s1037_s11, %s1033_s7  ;;  %p1041_p8 = scmp.lt.u32.totalorder %s1033_s7, %s1483_s24 }
  0xda   : > { %p1035_p9 = pnand %p1034_p2, %p1587_p5 }
  0xdb   : > { %p1040_p4 = por %p1039_p6, %p1038_p3 }
  0xdc   : > { %p1036_p11 = pneg %p1035_p9 }
  0xdd   : > { %p1042_p0 = por %p1041_p8, %p1040_p4 }
  0xdf   : > { %p1043_p7 = pnand %p1042_p0, %p1036_p11 }
  0xe1   : > { %1046 = shalt.err (!%p1043_p7)
}
  0xe2   : > { %763 = dma.vmem_to_hbm [thread:$0]  (%p1587_p5), %s1361_s15, 128, %s1483_s24, %s1388_s29  }
  0xe3 PF: > { %s504_s18 = sand.u32 1, %s1093_s21   ;;  %p1590_p13 = scmp.ne.s32.totalorder %s1575_s12, 0 }
  0xe4   : > { %p1591_p10 = scmp.ge.s32.totalorder %s1113_s26, 2  ;;  %s505_s23 = scalar_lea.sflag [#allocation4], %s504_s18 }
  0xe6   : > { %p777_p12 = pnand %p1591_p10, %p1590_p13 }
  0xe8   : > { %1080 = dma.done.wait (!%p777_p12), %s505_s23, 384  }
  0xe9   : > { %1082 = vsyncadd (!%p777_p12), %s505_s23, 4294966912  ;;  %s1592_s17 = sadd.s32 4294967294, %s1113_s26  }
  0xea   : > { %s513_s19 = sand.u32 1, %s1592_s17  }
  0xeb   : > { %s514_s9 = scalar_lea.sflag [#allocation9], %s513_s19 }
  0xec   : > { %1084 = dma.done.wait (!%p777_p12), %s514_s9, 256  }
  0xed   : > { %1086 = vsyncadd (!%p777_p12), %s514_s9, 4294967040  ;;  %s532_s10 = scalar_lea.sflag [#allocation12], %s513_s19 }
  0xee   : > { %1088 = dma.done.wait (!%p777_p12), %s532_s10, 256  }
  0xef   : > { %1090 = vsyncadd (!%p777_p12), %s532_s10, 4294967040  ;;  %s32_s26 = sadd.s32 1, %s1113_s26   ;;  %s1593_s21 = sld [smem:[#allocation19_spill]] }
  0xf0   : > { %p29_p5 = scmp.ge.s32.totalorder %s32_s26, 4   ;;  %s1594_s22 = sld [smem:[#allocation20_spill]] }
  0xf1   : > { %s1595_s23 = sld [smem:[#allocation23_spill]]  ;;  %s1596_s24 = sld [smem:[#allocation21_spill]] }
  0xf2   : > { %s1597_s25 = sld [smem:[#allocation22_spill]]  ;;  %31 = sbr.rel (!%p29_p5) target bundleno = 15 (0xf), region = 150 }
  0xf9   :  { %546 = vsyncpa [#allocation3], 1 }
  0xfa   :  { %548 = vsyncpa [#allocation3 + $0x1], 1 }
  0xfb   :  { %549 = vsyncpa [#allocation6], 1 }
  0xfc   :  { %551 = vsyncpa [#allocation6 + $0x1], 1 }
  0xfd   :  { %552 = vsyncpa [#allocation4], 1 }
  0xfe   :  { %554 = vsyncpa [#allocation4 + $0x1], 1 }
  0xff   :  { %555 = vsyncpa [#allocation9], 1 }
 0x100   :  { %557 = vsyncpa [#allocation9 + $0x1], 1 }
 0x101   :  { %558 = vsyncpa [#allocation12], 1 }
 0x102   :  { %560 = vsyncpa [#allocation12 + $0x1], 1 }

</bundles_post_ra>
